<compile_context>
chip_gen: v6e
topology: v6e:2x2x1
jax: 0.10.0
libtpu: 0.0.40
codegen_flags: <defaults>
</compile_context>

<pallas_src>
import jax
import jax.numpy as jnp
from jax.experimental import pallas as pl
from jax.experimental.pallas import tpu as pltpu


def _round_up(x, m):
    return ((x + m - 1) // m) * m


def _additive_attention_kernel(cv_ref, w_ref, b_ref, q_ref, out_ref):
    x = cv_ref[...]                       # (TB, S, Dp)  candidate vectors
    w = w_ref[...]                        # (Dp, Qp)     pre-transposed Linear weight
    b = b_ref[...]                        # (1, Qp)      Linear bias
    qv = q_ref[...]                       # (1, Qp)      attention query vector

    tb, s, d = x.shape

    # Projection: tanh(x @ W + b) as one lane-dense 2-D MXU matmul.
    x2 = x.reshape(tb * s, d)
    proj = jnp.tanh(
        jnp.dot(x2, w, preferred_element_type=jnp.float32) + b)      # (TB*S, Qp)

    # Attention logits: <proj, query> per (batch, clicked-news) row.
    scores = jnp.sum(proj.reshape(tb, s, -1) * qv, axis=-1)          # (TB, S)

    # Numerically-stable softmax over the clicked-news axis.
    m = jnp.max(scores, axis=-1, keepdims=True)                      # (TB, 1)
    p = jnp.exp(scores - m)
    denom = jnp.sum(p, axis=-1, keepdims=True)                       # (TB, 1)
    wts = p * pl.reciprocal(denom, approx=False)                     # (TB, S)

    # Weighted sum of candidate vectors -> user vector.
    out = jnp.sum(wts[:, :, None] * x, axis=1)                       # (TB, Dp)
    out_ref[...] = out.astype(out_ref.dtype)


def user_encoder_forward(clicked_news_vector, linear_weight, linear_bias,
                         query_vector, *, batch_block=8):
    """
    clicked_news_vector: (B, S, D) f32   (num_clicked_news_a_user = S, num_filters = D)
    linear_weight:       (Q, D)    f32   (PyTorch nn.Linear layout)
    linear_bias:         (Q,)      f32
    query_vector:        (Q,)      f32
    returns:             (B, D)    f32
    """
    B, S, D = clicked_news_vector.shape
    Q = query_vector.shape[0]

    # Lane-dense padding of feature / query dims (zeros are exactly neutral).
    Dp = _round_up(D, 128)
    Qp = _round_up(Q, 128)

    x = clicked_news_vector.astype(jnp.float32)
    if Dp != D:
        x = jnp.pad(x, ((0, 0), (0, 0), (0, Dp - D)))

    w_t = jnp.pad(linear_weight.astype(jnp.float32),
                  ((0, Qp - Q), (0, Dp - D))).T                      # (Dp, Qp)
    b = jnp.pad(linear_bias.astype(jnp.float32), (0, Qp - Q)).reshape(1, Qp)
    q = jnp.pad(query_vector.astype(jnp.float32), (0, Qp - Q)).reshape(1, Qp)

    tb = min(batch_block, B)
    grid = (pl.cdiv(B, tb),)

    out = pl.pallas_call(
        _additive_attention_kernel,
        out_shape=jax.ShapeDtypeStruct((B, Dp), jnp.float32),
        grid_spec=pltpu.PrefetchScalarGridSpec(
            num_scalar_prefetch=0,
            grid=grid,
            in_specs=[
                pl.BlockSpec((tb, S, Dp), lambda i: (i, 0, 0)),   # batch-tiled input
                pl.BlockSpec((Dp, Qp), lambda i: (0, 0)),          # resident weight
                pl.BlockSpec((1, Qp), lambda i: (0, 0)),           # resident bias
                pl.BlockSpec((1, Qp), lambda i: (0, 0)),           # resident query
            ],
            out_specs=pl.BlockSpec((tb, Dp), lambda i: (i, 0)),
        ),
        compiler_params=pltpu.CompilerParams(
            dimension_semantics=("parallel",)),
    )(x, w_t, b, q)

    return out[:, :D] if Dp != D else out


def _reference(clicked, W, b, q):
    temp = jnp.tanh(jnp.einsum("bsd,qd->bsq", clicked, W) + b)
    scores = jnp.einsum("bsq,q->bs", temp, q)
    weights = jax.nn.softmax(scores, axis=1)
    return jnp.einsum("bs,bsd->bd", weights, clicked)


if __name__ == "__main__":
    # Small, deterministic synthetic setup consistent with the module:
    #   batch=4, num_clicked_news_a_user=16,
    #   num_filters = embedding_mid_dim = 128, query_vector_dim = 64.
    B, S, D, Q = 4, 16, 128, 64

    key = jax.random.PRNGKey(0)
    k_x, k_w, k_b, k_q = jax.random.split(key, 4)

    clicked = jax.random.normal(k_x, (B, S, D), dtype=jnp.float32)

    # nn.Linear default init: U(-1/sqrt(in_features), 1/sqrt(in_features)).
    bound = 1.0 / (D ** 0.5)
    W = jax.random.uniform(k_w, (Q, D), minval=-bound, maxval=bound,
                           dtype=jnp.float32)
    b = jax.random.uniform(k_b, (Q,), minval=-bound, maxval=bound,
                           dtype=jnp.float32)
    # attention_query_vector: U(-0.1, 0.1).
    q = jax.random.uniform(k_q, (Q,), minval=-0.1, maxval=0.1,
                           dtype=jnp.float32)

    out = user_encoder_forward(clicked, W, b, q)
    out = jax.block_until_ready(out)

    ref = _reference(clicked, W, b, q)
    assert out.shape == (B, D)
    assert jnp.allclose(out, ref, atol=1e-4, rtol=1e-4)

    print("KERNEL_OK")
</pallas_src>

<mosaic_0001>
module attributes {stable_mosaic.version = 11 : i64} {
  func.func @_additive_attention_kernel(%arg0: i32, %arg1: memref<4x16x128xf32, #tpu.memory_space<vmem>>, %arg2: memref<128x128xf32, #tpu.memory_space<vmem>>, %arg3: memref<1x128xf32, #tpu.memory_space<vmem>>, %arg4: memref<1x128xf32, #tpu.memory_space<vmem>>, %arg5: memref<4x128xf32, #tpu.memory_space<vmem>>) attributes {dimension_semantics = [#tpu.dimension_semantics<parallel>], iteration_bounds = array<i64: 1>, scalar_prefetch = 0 : i64, scratch_operands = 0 : i64, tpu.core_type = #tpu.core_type<tc>, window_params = [{transform_indices = @transform_0, window_bounds = array<i64: 4, 16, 128>}, {pipeline_mode = #tpu.pipeline_mode<synchronous>, transform_indices = @transform_1, window_bounds = array<i64: 128, 128>}, {pipeline_mode = #tpu.pipeline_mode<synchronous>, transform_indices = @transform_2, window_bounds = array<i64: 1, 128>}, {pipeline_mode = #tpu.pipeline_mode<synchronous>, transform_indices = @transform_3, window_bounds = array<i64: 1, 128>}, {transform_indices = @transform_4, window_bounds = array<i64: 4, 128>}]} {
    %c0 = arith.constant 0 : index
    %c0_0 = arith.constant 0 : index
    %c0_1 = arith.constant 0 : index
    %0 = vector.load %arg1[%c0, %c0_0, %c0_1] : memref<4x16x128xf32, #tpu.memory_space<vmem>>, vector<4x16x128xf32>
    %c0_2 = arith.constant 0 : index
    %c0_3 = arith.constant 0 : index
    %1 = vector.load %arg2[%c0_2, %c0_3] : memref<128x128xf32, #tpu.memory_space<vmem>>, vector<128x128xf32>
    %c0_4 = arith.constant 0 : index
    %c0_5 = arith.constant 0 : index
    %2 = vector.load %arg3[%c0_4, %c0_5] : memref<1x128xf32, #tpu.memory_space<vmem>>, vector<1x128xf32>
    %c0_6 = arith.constant 0 : index
    %c0_7 = arith.constant 0 : index
    %3 = vector.load %arg4[%c0_6, %c0_7] : memref<1x128xf32, #tpu.memory_space<vmem>>, vector<1x128xf32>
    %4 = vector.shape_cast %0 : vector<4x16x128xf32> to vector<64x128xf32>
    %cst = arith.constant dense<0.000000e+00> : vector<64x128xf32>
    %5 = tpu.matmul %4, %1, %cst {dimension_numbers = #tpu.dot_dimension_numbers<[1], [0], [0], [1], [0, 0, 1, 1], [], []>} : vector<64x128xf32>, vector<128x128xf32>, vector<64x128xf32> -> vector<64x128xf32>
    %6 = vector.broadcast %2 : vector<1x128xf32> to vector<64x128xf32>
    %7 = arith.addf %5, %6 : vector<64x128xf32>
    %8 = math.tanh %7 : vector<64x128xf32>
    %9 = vector.shape_cast %8 : vector<64x128xf32> to vector<4x16x128xf32>
    %10 = vector.shape_cast %3 : vector<1x128xf32> to vector<1x1x128xf32>
    %11 = vector.broadcast %10 : vector<1x1x128xf32> to vector<4x16x128xf32>
    %12 = arith.mulf %9, %11 : vector<4x16x128xf32>
    %cst_8 = arith.constant dense<0.000000e+00> : vector<4x16xf32>
    %13 = vector.multi_reduction <add>, %12, %cst_8 [2] : vector<4x16x128xf32> to vector<4x16xf32>
    %cst_9 = arith.constant dense<0xFF800000> : vector<4xf32>
    %14 = vector.multi_reduction <maximumf>, %13, %cst_9 [1] : vector<4x16xf32> to vector<4xf32>
    %15 = vector.shape_cast %14 : vector<4xf32> to vector<4x1xf32>
    %16 = vector.broadcast %15 : vector<4x1xf32> to vector<4x16xf32>
    %17 = arith.subf %13, %16 : vector<4x16xf32>
    %18 = math.exp %17 : vector<4x16xf32>
    %cst_10 = arith.constant dense<0.000000e+00> : vector<4xf32>
    %19 = vector.multi_reduction <add>, %18, %cst_10 [1] : vector<4x16xf32> to vector<4xf32>
    %20 = vector.shape_cast %19 : vector<4xf32> to vector<4x1xf32>
    %21 = tpu.reciprocal %20 : vector<4x1xf32> -> vector<4x1xf32>
    %22 = vector.broadcast %21 : vector<4x1xf32> to vector<4x16xf32>
    %23 = arith.mulf %18, %22 : vector<4x16xf32>
    %24 = vector.shape_cast %23 : vector<4x16xf32> to vector<4x16x1xf32>
    %25 = vector.broadcast %24 : vector<4x16x1xf32> to vector<4x16x128xf32>
    %26 = arith.mulf %25, %0 : vector<4x16x128xf32>
    %cst_11 = arith.constant dense<0.000000e+00> : vector<4x128xf32>
    %27 = vector.multi_reduction <add>, %26, %cst_11 [1] : vector<4x16x128xf32> to vector<4x128xf32>
    %c0_12 = arith.constant 0 : index
    %c0_13 = arith.constant 0 : index
    %28 = vector.load %arg5[%c0_12, %c0_13] : memref<4x128xf32, #tpu.memory_space<vmem>>, vector<4x128xf32>
    tpu.vector_store %arg5[%c0_12, %c0_13], %27 {strides = array<i32>} : memref<4x128xf32, #tpu.memory_space<vmem>>, vector<4x128xf32>,
    return
  }
  func.func @transform_0(%arg0: i32) -> (i32, i32, i32) {
    %c0_i32 = arith.constant 0 : i32
    %c0_i32_0 = arith.constant 0 : i32
    %c0_i32_1 = arith.constant 0 : i32
    return %arg0, %c0_i32, %c0_i32_0 : i32, i32, i32
  }
  func.func @transform_1(%arg0: i32) -> (i32, i32) {
    %c0_i32 = arith.constant 0 : i32
    %c0_i32_0 = arith.constant 0 : i32
    %c0_i32_1 = arith.constant 0 : i32
    return %c0_i32, %c0_i32_0 : i32, i32
  }
  func.func @transform_2(%arg0: i32) -> (i32, i32) {
    %c0_i32 = arith.constant 0 : i32
    %c0_i32_0 = arith.constant 0 : i32
    %c0_i32_1 = arith.constant 0 : i32
    return %c0_i32, %c0_i32_0 : i32, i32
  }
  func.func @transform_3(%arg0: i32) -> (i32, i32) {
    %c0_i32 = arith.constant 0 : i32
    %c0_i32_0 = arith.constant 0 : i32
    %c0_i32_1 = arith.constant 0 : i32
    return %c0_i32, %c0_i32_0 : i32, i32
  }
  func.func @transform_4(%arg0: i32) -> (i32, i32) {
    %c0_i32 = arith.constant 0 : i32
    %c0_i32_0 = arith.constant 0 : i32
    return %arg0, %c0_i32 : i32, i32
  }
}

</mosaic_0001>

<bundles_post_ra>
// kernel: tpu_custom_call.1
= control target key start
LH: loop header
LB: loop body
LE: loop exit
PB: predicated region body
PF: predicated region fallthrough
CT: control target
= control target key end

     0   :  { %9 = vsyncpa [#allocation3], 0  ;;  %s882_s0 = inlined_call_operand.hbm [shape: f32[4,16,128], index: 0, kind: input, shape index: {}]   ;;  %s883_s1 = inlined_call_operand.hbm [shape: f32[128,128], index: 1, kind: input, shape index: {}]   ;;  %s884_s2 = inlined_call_operand.vmem [shape: f32[1,128], index: 2, kind: input, shape index: {}]   ;;  %s885_s3 = inlined_call_operand.vmem [shape: f32[1,128], index: 3, kind: input, shape index: {}]   ;;  %s886_s4 = inlined_call_operand.hbm [shape: f32[4,128], index: 4, kind: output, shape index: {}]  }
   0x1   :  { %10 = vsyncpa [#allocation6], 0 }
   0x2   :  { %11 = vsyncpa [#allocation4], 0  ;;  %s741_s15 = smov [#allocation2]  }
   0x3   :  { %s17_s16 = sshll.u32 %s741_s15, 4  ;;  %s18_s16 = int_to_ptr.vmem [resolvable:$true] %s17_s16 }
   0x4   :  { %s683_s17 = scalar_lea.vmem %s18_s16, 1024  ;;  %p688_p1 = scmp.lt.s32.totalorder %s18_s16, %s18_s16 }
   0x5   :  { %p684_p0 = scmp.ne.s32.totalorder %s18_s16, %s683_s17  ;;  %p689_p2 = scmp.lt.s32.totalorder %s683_s17, %s683_s17 }
   0x7   :  { %p690_p3 = por %p689_p2, %p688_p1 }
   0x9   :  { %p691_p4 = pnand %p690_p3, %p684_p0 }
   0xb   :  { %694 = shalt.err (!%p691_p4)
}
   0xc   :  { %s742_s18 = smov 128   ;;  %s743_s19 = smov 8  }
   0xd   :  { %23 = dma.hbm_to_vmem [thread:$0]  %s882_s0, 1024, %s18_s16, [#allocation3], %s742_s18, %s742_s18, %s743_s19  }
   0xe   :  { %s744_s22 = smov [#allocation5]  }
   0xf   :  { %s29_s23 = sshll.u32 %s744_s22, 4  ;;  %s30_s23 = int_to_ptr.vmem [resolvable:$true] %s29_s23 }
  0x10   :  { %s703_s24 = scalar_lea.vmem %s30_s23, 2048  ;;  %p708_p6 = scmp.lt.s32.totalorder %s30_s23, %s30_s23 }
  0x11   :  { %p704_p5 = scmp.ne.s32.totalorder %s30_s23, %s703_s24  ;;  %p709_p7 = scmp.lt.s32.totalorder %s703_s24, %s703_s24 }
  0x13   :  { %p710_p8 = por %p709_p7, %p708_p6 }
  0x15   :  { %p711_p9 = pnand %p710_p8, %p704_p5 }
  0x17   :  { %714 = shalt.err (!%p711_p9)
}
  0x18   :  { %35 = dma.hbm_to_vmem [thread:$0]  %s883_s1, 2048, %s30_s23, [#allocation6], %s742_s18, %s742_s18, %s743_s19  }
  0x19   :  { %735 = dma.done.wait [#allocation3], 1024  }
  0x1a   :  { %736 = vsyncadd [#allocation3], 4294966272 }
  0x1b   :  { %737 = dma.done.wait [#allocation6], 2048  }
  0x1c   :  { %738 = vsyncadd [#allocation6], 4294965248  ;;  %v69_v0 = vld [vmem:[#allocation5 + $0x78] sm:$0xff]  ;;  %v68_v1 = vld [vmem:[#allocation5 + $0x70] sm:$0xff]  ;;  %v229_v58 = vlaneseq  ;;  %vm240_vm0 = vcmask 130112   ;;  %vm269_vm1 = vcmask 1041409  }
  0x1d   :  { %557 = vmatprep.subr.mxu0 %v69_v0  ;;  %601 = vmatprep.subr.mxu1 %v69_v0  ;;  %v67_v2 = vld [vmem:[#allocation5 + $0x68] sm:$0xff]  ;;  %v66_v3 = vld [vmem:[#allocation5 + $0x60] sm:$0xff]  ;;  %v65_v4 = vld [vmem:[#allocation5 + $0x58] sm:$0xff]  ;;  %vm271_vm2 = vcmask 1042434   ;;  %vm273_vm3 = vcmask 1043459   ;;  %vm276_vm4 = vcmask 125952  }
  0x1e   :  { %558 = vmatpush3.msra.mxu0 %v69_v0  ;;  %617 = vmatpush3.msra.mxu1 %v69_v0  ;;  %v64_v5 = vld [vmem:[#allocation5 + $0x50] sm:$0xff]  ;;  %v63_v6 = vld [vmem:[#allocation5 + $0x48] sm:$0xff]  ;;  %v62_v7 = vld [vmem:[#allocation5 + $0x40] sm:$0xff]  ;;  %v230_v59 = vand.u32 127, %v229_v58  ;;  %v808_v62 = vshrl.u32 %v229_v58, 7 }
  0x1f   :  { %559 = vmatprep.subr.mxu0 %v68_v1  ;;  %602 = vmatprep.subr.mxu1 %v68_v1  ;;  %v61_v8 = vld [vmem:[#allocation5 + $0x38] sm:$0xff]  ;;  %v60_v9 = vld [vmem:[#allocation5 + $0x30] sm:$0xff]  ;;  %v59_v10 = vld [vmem:[#allocation5 + $0x28] sm:$0xff] }
  0x20   :  { %560 = vmatpush3.msra.mxu0 %v68_v1  ;;  %618 = vmatpush3.msra.mxu1 %v68_v1  ;;  %v58_v11 = vld [vmem:[#allocation5 + $0x20] sm:$0xff]  ;;  %v57_v12 = vld [vmem:[#allocation5 + $0x18] sm:$0xff]  ;;  %v56_v13 = vld [vmem:[#allocation5 + $0x10] sm:$0xff]  ;;  %v235_v63 = vadd.s32 4294967288, %v230_v59  ;;  %v811_v0 = vsub.s32 %v230_v59, %v808_v62 }
  0x21   :  { %561 = vmatprep.subr.mxu0 %v67_v2  ;;  %603 = vmatprep.subr.mxu1 %v67_v2  ;;  %v55_v14 = vld [vmem:[#allocation5 + $0x8] sm:$0xff]  ;;  %v54_v15 = vld [vmem:[#allocation5] sm:$0xff]  ;;  %v786_v20 = vld [vmem:[#allocation2 + $0x10] sm:$0xff] }
  0x22   :  { %562 = vmatpush3.msra.mxu0 %v67_v2  ;;  %619 = vmatpush3.msra.mxu1 %v67_v2  ;;  %v778_v16 = vld [vmem:[#allocation2] sm:$0xff]  ;;  %v782_v18 = vld [vmem:[#allocation2 + $0x8] sm:$0xff]  ;;  %v788_v21 = vld [vmem:[#allocation2 + $0x30] sm:$0xff] }
  0x23   :  { %563 = vmatprep.subr.mxu0 %v66_v3  ;;  %604 = vmatprep.subr.mxu1 %v66_v3  ;;  %v780_v17 = vld [vmem:[#allocation2 + $0x20] sm:$0xff]  ;;  %v784_v19 = vld [vmem:[#allocation2 + $0x28] sm:$0xff]  ;;  %v795_v22 = vld [vmem:[#allocation2 + $0x18] sm:$0xff] }
  0x24   :  { %564 = vmatpush3.msra.mxu0 %v66_v3  ;;  %620 = vmatpush3.msra.mxu1 %v66_v3  ;;  %v798_v23 = vld [vmem:[#allocation2 + $0x38] sm:$0xff]  ;;  %v531_v24 = vld [vmem:[%s884_s2] ss:$0 sm:$0xff]  ;;  %v814_v3 = vsub.s32 %v235_v63, %v808_v62 }
  0x25   :  { %565 = vmatprep.subr.mxu0 %v65_v4  ;;  %605 = vmatprep.subr.mxu1 %v65_v4  ;;  %v532_v41 = vld [vmem:[%s885_s3] ss:$0 sm:$0xff]  ;;  %s746_s3 = smov [#allocation7]  }
  0x26   :  { %566 = vmatpush3.msra.mxu0 %v65_v4  ;;  %621 = vmatpush3.msra.mxu1 %v65_v4  ;;  %s521_s28 = sshll.u32 %s746_s3, 4  ;;  %s522_s28 = int_to_ptr.vmem [resolvable:$true] %s521_s28 }
  0x27   :  { %567 = vmatprep.subr.mxu0 %v64_v5  ;;  %606 = vmatprep.subr.mxu1 %v64_v5  ;;  %s715_s29 = scalar_lea.vmem %s522_s28, 64  ;;  %p720_p11 = scmp.lt.s32.totalorder %s522_s28, %s522_s28 }
  0x28   :  { %568 = vmatpush3.msra.mxu0 %v64_v5  ;;  %622 = vmatpush3.msra.mxu1 %v64_v5  ;;  %p716_p10 = scmp.ne.s32.totalorder %s522_s28, %s715_s29  ;;  %p721_p12 = scmp.lt.s32.totalorder %s715_s29, %s715_s29 }
  0x29   :  { %569 = vmatprep.subr.mxu0 %v63_v6  ;;  %607 = vmatprep.subr.mxu1 %v63_v6 }
  0x2a   :  { %570 = vmatpush3.msra.mxu0 %v63_v6  ;;  %623 = vmatpush3.msra.mxu1 %v63_v6  ;;  %p722_p13 = por %p721_p12, %p720_p11 }
  0x2b   :  { %571 = vmatprep.subr.mxu0 %v62_v7  ;;  %608 = vmatprep.subr.mxu1 %v62_v7 }
  0x2c   :  { %572 = vmatpush3.msra.mxu0 %v62_v7  ;;  %624 = vmatpush3.msra.mxu1 %v62_v7  ;;  %p723_p0 = pnand %p722_p13, %p716_p10 }
  0x2d   :  { %573 = vmatprep.subr.mxu0 %v61_v8  ;;  %609 = vmatprep.subr.mxu1 %v61_v8 }
  0x2e   :  { %574 = vmatpush3.msra.mxu0 %v61_v8  ;;  %625 = vmatpush3.msra.mxu1 %v61_v8 }
  0x2f   :  { %575 = vmatprep.subr.mxu0 %v60_v9  ;;  %610 = vmatprep.subr.mxu1 %v60_v9 }
  0x30   :  { %576 = vmatpush3.msra.mxu0 %v60_v9  ;;  %626 = vmatpush3.msra.mxu1 %v60_v9 }
  0x31   :  { %577 = vmatprep.subr.mxu0 %v59_v10  ;;  %611 = vmatprep.subr.mxu1 %v59_v10 }
  0x32   :  { %578 = vmatpush3.msra.mxu0 %v59_v10  ;;  %627 = vmatpush3.msra.mxu1 %v59_v10 }
  0x33   :  { %579 = vmatprep.subr.mxu0 %v58_v11  ;;  %612 = vmatprep.subr.mxu1 %v58_v11 }
  0x34   :  { %580 = vmatpush3.msra.mxu0 %v58_v11  ;;  %628 = vmatpush3.msra.mxu1 %v58_v11 }
  0x35   :  { %581 = vmatprep.subr.mxu0 %v57_v12  ;;  %613 = vmatprep.subr.mxu1 %v57_v12 }
  0x36   :  { %582 = vmatpush3.msra.mxu0 %v57_v12  ;;  %629 = vmatpush3.msra.mxu1 %v57_v12 }
  0x37   :  { %583 = vmatprep.subr.mxu0 %v56_v13  ;;  %614 = vmatprep.subr.mxu1 %v56_v13 }
  0x38   :  { %584 = vmatpush3.msra.mxu0 %v56_v13  ;;  %630 = vmatpush3.msra.mxu1 %v56_v13 }
  0x39   :  { %585 = vmatprep.subr.mxu0 %v55_v14  ;;  %615 = vmatprep.subr.mxu1 %v55_v14 }
  0x3a   :  { %586 = vmatpush3.msra.mxu0 %v55_v14  ;;  %631 = vmatpush3.msra.mxu1 %v55_v14 }
  0x3b   :  { %587 = vmatprep.subr.mxu0 %v54_v15  ;;  %616 = vmatprep.subr.mxu1 %v54_v15 }
  0x3c   :  { %588 = vmatpush3.msra.mxu0 %v54_v15  ;;  %632 = vmatpush3.msra.mxu1 %v54_v15 }
  0x3d   :  { %589 = vmatprep.mubr.f32.mxu0 %v778_v16  ;;  %595 = vmatprep.mubr.f32.mxu1 %v780_v17 }
  0x3e   :  { %590 = vmatmul.mubr.f32.vlgmr.msra.gmra.mxu0 %v782_v18  ;;  %596 = vmatmul.mubr.f32.vlgmr.msra.gmra.mxu1 %v784_v19 }
  0x3f   :  { %592 = vmatprep.mubr.f32.mxu0 %v786_v20  ;;  %598 = vmatprep.mubr.f32.mxu1 %v788_v21 }
  0x42   :  { %593 = vmatmul.mubr.f32.gmra.mxu0 %v795_v22  ;;  %599 = vmatmul.mubr.f32.gmra.mxu1 %v798_v23 }
  0xfe   :  { %v591_v25 = vpop.f32.mrf.mxu0  ;;  %v597_v26 = vpop.f32.mrf.mxu1 }
  0xff   :  { %v150_v27 = vadd.f32 %v591_v25, %v531_v24  ;;  %v170_v28 = vadd.f32 %v597_v26, %v531_v24 }
 0x100   :  { %v144_v29 = vpop.f32.mrf.mxu0  ;;  %v164_v30 = vpop.f32.mrf.mxu1 }
 0x101   :  { %641 = vtanh.f32 %v150_v27  ;;  %v145_v31 = vadd.f32 %v531_v24, %v144_v29  ;;  %v165_v34 = vadd.f32 %v531_v24, %v164_v30 }
 0x102   :  { %643 = vtanh.f32 %v170_v28  ;;  %v594_v32 = vpop.f32.mrf.mxu0  ;;  %v600_v33 = vpop.f32.mrf.mxu1 }
 0x103   :  { %645 = vtanh.f32 %v145_v31  ;;  %v160_v35 = vadd.f32 %v594_v32, %v531_v24  ;;  %v180_v40 = vadd.f32 %v600_v33, %v531_v24  ;;  %v745_v32 = vmov 0  }
 0x104   :  { %v154_v36 = vpop.f32.mrf.mxu0  ;;  %v174_v37 = vpop.f32.mrf.mxu1  ;;  %640 = vset.pattern.permute.xlu0 %v745_v32  ;;  %639 = vset.pattern.permute.xlu1 %v745_v32  ;;  %v283_v33 = vsub.s32 0, %v808_v62 }
 0x105   :  { %647 = vtanh.f32 %v160_v35  ;;  %v155_v38 = vadd.f32 %v531_v24, %v154_v36  ;;  %v175_v39 = vadd.f32 %v531_v24, %v174_v37 }
 0x106   :  { %649 = vtanh.f32 %v165_v34  ;;  %v287_v34 = vsub.s32 1, %v808_v62 }
 0x107   :  { %651 = vtanh.f32 %v155_v38  ;;  %v291_v38 = vsub.s32 2, %v808_v62 }
 0x108   :  { %653 = vtanh.f32 %v175_v39 }
 0x109   :  { %655 = vtanh.f32 %v180_v40 }
 0x10e   :  { %v642_v42 = vpop.eup %641 }
 0x10f   :  { %v644_v43 = vpop.eup %643  ;;  %v198_v44 = vmul.f32 %v642_v42, %v532_v41 }
 0x110   :  { %v646_v45 = vpop.eup %645  ;;  %v202_v46 = vmul.f32 %v644_v43, %v532_v41 }
 0x111   :  { %207 = vadd.xlane.f32.xlu0 %v198_v44  ;;  %v197_v49 = vmul.f32 %v646_v45, %v532_v41 }
 0x112   :  { %v648_v47 = vpop.eup %647  ;;  %215 = vadd.xlane.f32.xlu1 %v202_v46 }
 0x113   :  { %v200_v48 = vmul.f32 %v648_v47, %v532_v41  ;;  %v650_v50 = vpop.eup %649  ;;  %v295_v47 = vsub.s32 3, %v808_v62 }
 0x114   :  { %v652_v51 = vpop.eup %651  ;;  %v201_v52 = vmul.f32 %v650_v50, %v532_v41 }
 0x115   :  { %205 = vadd.xlane.f32.xlu0 %v197_v49  ;;  %v654_v53 = vpop.eup %653  ;;  %v199_v54 = vmul.f32 %v652_v51, %v532_v41 }
 0x116   :  { %211 = vadd.xlane.f32.xlu1 %v200_v48  ;;  %v656_v55 = vpop.eup %655  ;;  %v203_v56 = vmul.f32 %v654_v53, %v532_v41 }
 0x117   :  { %v204_v57 = vmul.f32 %v656_v55, %v532_v41 }
 0x119   :  { %213 = vadd.xlane.f32.xlu0 %v201_v52 }
 0x11a   :  { %209 = vadd.xlane.f32.xlu1 %v199_v54 }
 0x11d   :  { %217 = vadd.xlane.f32.xlu0 %v203_v56 }
 0x11e   :  { %219 = vadd.xlane.f32.xlu1 %v204_v57 }
 0x19a   :  { %v208_v60 = vpop.xlane.xlu0 %207 }
 0x19b   :  { %v216_v61 = vpop.xlane.xlu1 %215  ;;  %v239_v8 = vrot.slane %v208_v60, %v814_v3 }
 0x19c   :  { %v258_v11 = vrot.slane %v216_v61, %v814_v3 }
 0x19e   :  { %v206_v1 = vpop.xlane.xlu0 %205 }
 0x19f   :  { %v212_v2 = vpop.xlane.xlu1 %211  ;;  %v234_v4 = vrot.slane %v206_v1, %v811_v0 }
 0x1a0   :  { %v249_v9 = vrot.slane %v212_v2, %v814_v3 }
 0x1a1   :  { %v241_v12 = vsel %vm240_vm0, %v239_v8, %v234_v4 }
 0x1a2   :  { %v214_v5 = vpop.xlane.xlu0 %213 }
 0x1a3   :  { %v210_v6 = vpop.xlane.xlu1 %209  ;;  %v254_v7 = vrot.slane %v214_v5, %v811_v0 }
 0x1a4   :  { %v245_v10 = vrot.slane %v210_v6, %v811_v0 }
 0x1a5   :  { %v259_v25 = vsel %vm240_vm0, %v258_v11, %v254_v7 }
 0x1a6   :  { %v250_v13 = vsel %vm240_vm0, %v249_v9, %v245_v10  ;;  %v218_v14 = vpop.xlane.xlu0 %217 }
 0x1a7   :  { %v220_v15 = vpop.xlane.xlu1 %219  ;;  %v263_v24 = vrot.slane %v218_v14, %v811_v0  ;;  %v270_v26 = vsel %vm269_vm1, %v250_v13, %v241_v12 }
 0x1a8   :  { %v267_v27 = vrot.slane %v220_v15, %v814_v3  ;;  %v272_v29 = vsel %vm271_vm2, %v259_v25, %v270_v26 }
 0x1aa   :  { %v268_v28 = vsel %vm240_vm0, %v267_v27, %v263_v24 }
 0x1ab   :  { %v274_v30 = vsel %vm273_vm3, %v268_v28, %v272_v29 }
 0x1ac   :  { %v277_v31 = vsel %vm276_vm4, %v274_v30, -inf }
 0x1ad   :  { %278 = vmax.xlane.f32.xlu0 %v277_v31 }
 0x236   :  { %v279_v35 = vpop.xlane.xlu0 %278 }
 0x237   :  { %v284_v36 = vrot.slane %v279_v35, %v283_v33  ;;  %v288_v37 = vrot.slane %v279_v35, %v287_v34  ;;  %v292_v44 = vrot.slane %v279_v35, %v291_v38  ;;  %v296_v50 = vrot.slane %v279_v35, %v295_v47 }
 0x239   :  { %v301_v39 = vsub.f32 %v206_v1, %v284_v36  ;;  %v302_v40 = vsub.f32 %v208_v60, %v284_v36  ;;  %v303_v41 = vsub.f32 %v210_v6, %v288_v37  ;;  %v304_v45 = vsub.f32 %v212_v2, %v288_v37 }
 0x23a   :  { %v305_v48 = vsub.f32 %v214_v5, %v292_v44  ;;  %v306_v51 = vsub.f32 %v216_v61, %v292_v44  ;;  %v307_v53 = vsub.f32 %v218_v14, %v296_v50  ;;  %v308_v57 = vsub.f32 %v220_v15, %v296_v50 }
 0x23b   :  { %v309_v42 = vmul.f32 1.442695, %v301_v39  ;;  %v311_v43 = vmul.f32 1.442695, %v302_v40  ;;  %v313_v46 = vmul.f32 1.442695, %v303_v41 }
 0x23c   :  { %v315_v49 = vmul.f32 1.442695, %v304_v45  ;;  %v317_v52 = vmul.f32 1.442695, %v305_v48  ;;  %v319_v54 = vmul.f32 1.442695, %v306_v51 }
 0x23d   :  { %657 = vpow2.f32 %v309_v42  ;;  %v321_v58 = vmul.f32 1.442695, %v307_v53  ;;  %v323_v60 = vmul.f32 1.442695, %v308_v57 }
 0x23e   :  { %659 = vpow2.f32 %v311_v43 }
 0x23f   :  { %661 = vpow2.f32 %v313_v46 }
 0x240   :  { %663 = vpow2.f32 %v315_v49 }
 0x241   :  { %665 = vpow2.f32 %v317_v52 }
 0x242   :  { %667 = vpow2.f32 %v319_v54 }
 0x243   :  { %669 = vpow2.f32 %v321_v58 }
 0x244   :  { %671 = vpow2.f32 %v323_v60 }
 0x24a   :  { %v658_v55 = vpop.eup %657 }
 0x24b   :  { %v660_v56 = vpop.eup %659  ;;  %334 = vperm.xlu1 %639, %v658_v55  }
 0x24c   :  { %337 = vperm.xlu0 %640, %v660_v56   ;;  %v662_v59 = vpop.eup %661 }
 0x24d   :  { %v664_v63 = vpop.eup %663 }
 0x24e   :  { %v666_v61 = vpop.eup %665 }
 0x24f   :  { %340 = vperm.xlu1 %639, %v662_v59   ;;  %v668_v1 = vpop.eup %667 }
 0x250   :  { %v670_v2 = vpop.eup %669 }
 0x251   :  { %v672_v4 = vpop.eup %671 }
 0x253   :  { %343 = vperm.xlu1 %639, %v664_v63  }
 0x257   :  { %346 = vperm.xlu1 %639, %v666_v61  }
 0x25b   :  { %349 = vperm.xlu1 %639, %v668_v1  }
 0x25f   :  { %352 = vperm.xlu1 %639, %v670_v2  }
 0x263   :  { %355 = vperm.xlu1 %639, %v672_v4  }
 0x2c6   :  { %v335_v5 = vpop.permute.xlu1 %334 }
 0x2c7   :  { %v338_v10 = vpop.permute.xlu0 %337  ;;  %v360_v15 = vrot.slane %v335_v5, %v811_v0 }
 0x2c8   :  { %v364_v14 = vrot.slane %v338_v10, %v814_v3 }
 0x2ca   :  { %v341_v6 = vpop.permute.xlu1 %340  ;;  %v365_v29 = vsel %vm240_vm0, %v364_v14, %v360_v15 }
 0x2cb   :  { %v369_v24 = vrot.slane %v341_v6, %v811_v0 }
 0x2ce   :  { %v344_v7 = vpop.permute.xlu1 %343 }
 0x2cf   :  { %v373_v11 = vrot.slane %v344_v7, %v814_v3 }
 0x2d1   :  { %v374_v26 = vsel %vm240_vm0, %v373_v11, %v369_v24 }
 0x2d2   :  { %v347_v8 = vpop.permute.xlu1 %346  ;;  %v393_v32 = vsel %vm269_vm1, %v374_v26, %v365_v29 }
 0x2d3   :  { %v378_v25 = vrot.slane %v347_v8, %v811_v0 }
 0x2d6   :  { %v350_v9 = vpop.permute.xlu1 %349 }
 0x2d7   :  { %v382_v12 = vrot.slane %v350_v9, %v814_v3 }
 0x2d9   :  { %v383_v27 = vsel %vm240_vm0, %v382_v12, %v378_v25 }
 0x2da   :  { %v353_v13 = vpop.permute.xlu1 %352  ;;  %v394_v36 = vsel %vm271_vm2, %v383_v27, %v393_v32 }
 0x2db   :  { %v387_v30 = vrot.slane %v353_v13, %v811_v0 }
 0x2de   :  { %v356_v28 = vpop.permute.xlu1 %355 }
 0x2df   :  { %v391_v31 = vrot.slane %v356_v28, %v814_v3 }
 0x2e1   :  { %v392_v35 = vsel %vm240_vm0, %v391_v31, %v387_v30 }
 0x2e2   :  { %v395_v37 = vsel %vm273_vm3, %v392_v35, %v394_v36 }
 0x2e3   :  { %v397_v39 = vsel %vm276_vm4, %v395_v37, 0.0 }
 0x2e4   :  { %398 = vadd.xlane.f32.xlu1 %v397_v39 }
 0x36d   :  { %v399_v40 = vpop.xlane.xlu1 %398 }
 0x36e   :  { %673 = vrcp.f32 %v399_v40 }
 0x37b   :  { %v674_v41 = vpop.eup %673 }
 0x37c   :  { %v405_v42 = vrot.slane %v674_v41, %v283_v33  ;;  %v409_v43 = vrot.slane %v674_v41, %v287_v34  ;;  %v413_v46 = vrot.slane %v674_v41, %v291_v38  ;;  %v417_v33 = vrot.slane %v674_v41, %v295_v47 }
 0x37e   :  { %v422_v0 = vmul.f32 %v658_v55, %v405_v42  ;;  %v423_v3 = vmul.f32 %v660_v56, %v405_v42  ;;  %v424_v44 = vmul.f32 %v662_v59, %v409_v43  ;;  %v425_v45 = vmul.f32 %v664_v63, %v409_v43 }
 0x37f   :  { %v426_v48 = vmul.f32 %v666_v61, %v413_v46  ;;  %v427_v49 = vmul.f32 %v668_v1, %v413_v46  ;;  %v428_v50 = vmul.f32 %v670_v2, %v417_v33  ;;  %v429_v51 = vmul.f32 %v672_v4, %v417_v33 }
 0x380   :  { %432 = vperm.xlu0 %640, %v422_v0  }
 0x384   :  { %437 = vperm.xlu0 %640, %v423_v3  }
 0x388   :  { %442 = vperm.xlu0 %640, %v424_v44  }
 0x38c   :  { %447 = vperm.xlu0 %640, %v425_v45  }
 0x390   :  { %452 = vperm.xlu0 %640, %v426_v48  }
 0x394   :  { %457 = vperm.xlu0 %640, %v427_v49  }
 0x398   :  { %462 = vperm.xlu0 %640, %v428_v50  }
 0x39c   :  { %467 = vperm.xlu0 %640, %v429_v51  }
 0x3fb   :  { %v433_v34 = vpop.permute.xlu0 %432 }
 0x3fc   :  { %v470_v57 = vmul.f32 %v433_v34, %v778_v16 }
 0x3ff   :  { %v438_v52 = vpop.permute.xlu0 %437 }
 0x400   :  { %v471_v55 = vmul.f32 %v438_v52, %v782_v18 }
 0x402   :  { %v478_v47 = vadd.f32 %v471_v55, %v470_v57 }
 0x403   :  { %v443_v53 = vpop.permute.xlu0 %442 }
 0x404   :  { %v472_v38 = vmul.f32 %v443_v53, %v786_v20  ;;  %v479_v63 = vrot.slane %v478_v47, 4 }
 0x406   :  { %v480_v18 = vadd.f32 %v479_v63, %v478_v47 }
 0x407   :  { %v448_v54 = vpop.permute.xlu0 %447 }
 0x408   :  { %v473_v56 = vmul.f32 %v448_v54, %v795_v22  ;;  %v481_v8 = vrot.slane %v480_v18, 2 }
 0x40a   :  { %v485_v58 = vadd.f32 %v473_v56, %v472_v38 }
 0x40b   :  { %v453_v62 = vpop.permute.xlu0 %452 }
 0x40c   :  { %v486_v59 = vrot.slane %v485_v58, 4  ;;  %v474_v61 = vmul.f32 %v453_v62, %v780_v17  ;;  %v482_v17 = vadd.f32 %v481_v8, %v480_v18 }
 0x40e   :  { %v487_v2 = vadd.f32 %v486_v59, %v485_v58  ;;  %v483_v25 = vrot.slane %v482_v17, 1 }
 0x40f   :  { %v458_v60 = vpop.permute.xlu0 %457 }
 0x410   :  { %v475_v1 = vmul.f32 %v458_v60, %v784_v19  ;;  %v488_v20 = vrot.slane %v487_v2, 2  ;;  %v484_v30 = vadd.f32 %v483_v25, %v482_v17 }
 0x412   :  { %v492_v4 = vadd.f32 %v475_v1, %v474_v61  ;;  %v489_v11 = vadd.f32 %v488_v20, %v487_v2 }
 0x413   :  { %v463_v5 = vpop.permute.xlu0 %462 }
 0x414   :  { %v493_v6 = vrot.slane %v492_v4, 4  ;;  %v476_v9 = vmul.f32 %v463_v5, %v788_v21  ;;  %v490_v19 = vrot.slane %v489_v11, 1 }
 0x416   :  { %v494_v7 = vadd.f32 %v493_v6, %v492_v4  ;;  %v491_v27 = vadd.f32 %v490_v19, %v489_v11 }
 0x417   :  { %v468_v22 = vpop.permute.xlu0 %467 }
 0x418   :  { %v495_v16 = vrot.slane %v494_v7, 2  ;;  %v477_v10 = vmul.f32 %v468_v22, %v798_v23  ;;  %v510_v23 = vsel %vm269_vm1, %v491_v27, %v484_v30 }
 0x41a   :  { %v499_v12 = vadd.f32 %v477_v10, %v476_v9  ;;  %v496_v13 = vadd.f32 %v495_v16, %v494_v7 }
 0x41c   :  { %v500_v14 = vrot.slane %v499_v12, 4  ;;  %v497_v24 = vrot.slane %v496_v13, 1 }
 0x41e   :  { %v501_v15 = vadd.f32 %v500_v14, %v499_v12  ;;  %v498_v29 = vadd.f32 %v497_v24, %v496_v13 }
 0x420   :  { %v502_v26 = vrot.slane %v501_v15, 2  ;;  %v511_v32 = vsel %vm271_vm2, %v498_v29, %v510_v23 }
 0x422   :  { %v503_v28 = vadd.f32 %v502_v26, %v501_v15 }
 0x424   :  { %v504_v31 = vrot.slane %v503_v28, 1 }
 0x426   :  { %v505_v21 = vadd.f32 %v504_v31, %v503_v28 }
 0x428   :  { %v512_v35 = vsel %vm273_vm3, %v505_v21, %v511_v32 }
 0x429   :  { %514 = vst [vmem:[#allocation7] sm:$0xf] %v512_v35 }
 0x42a   :  { %726 = shalt.err (!%p723_p0)
}
 0x42b   :  { %524 = dma.vmem_to_hbm [thread:$0]  %s522_s28, 64, %s886_s4, [#allocation4]  }
 0x42c   :  { %739 = dma.done.wait [#allocation4], 64  }
 0x42d   :  { %740 = vsyncadd [#allocation4], 4294967232 }
 0x42e   :  { %528 = vsyncpa [#allocation3], 1 }
 0x42f   :  { %529 = vsyncpa [#allocation6], 1 }
 0x430   :  { %530 = vsyncpa [#allocation4], 1 }

</bundles_post_ra>
